<compile_context>
chip_gen: v5e
topology: v5e:2x2
jax: 0.10.0
libtpu: 0.0.40
codegen_flags: <defaults>
</compile_context>

<pallas_src>
import jax
import jax.numpy as jnp
from jax.experimental import pallas as pl
from jax.experimental.pallas import tpu as pltpu


_LANES = 128                        # TPU lane width (last dim)
_MAX_BLOCK_ROWS = 2048              # (2048, 128) fp32 block = 1 MiB per pipeline buffer
_FUSED_MAX_BYTES = 2 * 1024 * 1024  # fused single-call path if padded fp32 fits here
_VMEM_LIMIT = 32 * 1024 * 1024      # safe on v5e/v6e (128 MiB phys) and v7x (64 MiB phys)


def _round_up(a: int, b: int) -> int:
    return ((a + b - 1) // b) * b


def _row_align(dtype) -> int:
    # Sublane tiling multiple: 8 for 32-bit dtypes, 16 for 16-bit, 32 for 8-bit.
    return max(8, 32 // jnp.dtype(dtype).itemsize)


# ---------------------------------------------------------------------------
# Fused path: whole (padded) vector resident in VMEM -> max, sum-of-exp and
# normalization in a single kernel.  1 HBM read + 1 write.
# ---------------------------------------------------------------------------
def _fused_softmax_kernel(x_ref, o_ref):
    x = x_ref[...].astype(jnp.float32)                                   # (R, 128)
    # Row (sublane) reduce first on the VPU, then a single cross-lane XLU reduce.
    m = jnp.max(jnp.max(x, axis=0, keepdims=True), axis=1, keepdims=True)   # (1,1)
    e = jnp.exp(x - m)                                 # -inf padding -> exp(-inf)=0
    s = jnp.sum(jnp.sum(e, axis=0, keepdims=True), axis=1, keepdims=True)   # (1,1)
    inv_s = 1.0 / s                                    # exact, once per call
    o_ref[...] = (e * inv_s).astype(o_ref.dtype)


# ---------------------------------------------------------------------------
# Two-pass path, pass 1: online (flash-style) max / sum-of-exp over row-chunks.
# Accumulators live in VMEM scratch; the single finalized scalar c = m + log(s)
# is written on the last grid step.
# ---------------------------------------------------------------------------
def _reduce_kernel(x_ref, c_ref, m_acc, s_acc):
    i = pl.program_id(0)

    @pl.when(i == 0)
    def _init():
        m_acc[...] = jnp.full(m_acc.shape, -jnp.inf, dtype=m_acc.dtype)
        s_acc[...] = jnp.zeros(s_acc.shape, dtype=s_acc.dtype)

    x = x_ref[...].astype(jnp.float32)                                   # (BR, 128)
    blk_max = jnp.max(jnp.max(x, axis=0, keepdims=True), axis=1, keepdims=True)
    m_old = m_acc[...]
    m_new = jnp.maximum(m_old, blk_max)
    e = jnp.exp(x - m_new)                                               # EUP
    blk_sum = jnp.sum(jnp.sum(e, axis=0, keepdims=True), axis=1, keepdims=True)
    # Rescale the running sum to the new max, add this chunk's contribution.
    s_acc[...] = s_acc[...] * jnp.exp(m_old - m_new) + blk_sum
    m_acc[...] = m_new

    @pl.when(i == pl.num_programs(0) - 1)
    def _finalize():
        # Exact log-sum-exp constant; s >= 1 so the log is safe.
        c_ref[...] = m_acc[...] + jnp.log(s_acc[...])


# ---------------------------------------------------------------------------
# Two-pass path, pass 2: y = exp(x - c), independent per row-chunk ("parallel").
# c is a single scalar held in SMEM.
# ---------------------------------------------------------------------------
def _normalize_kernel(c_ref, x_ref, o_ref):
    c = c_ref[0, 0]
    o_ref[...] = jnp.exp(x_ref[...].astype(jnp.float32) - c).astype(o_ref.dtype)


def softmax_stable(
    x: jax.Array,
    *,
    max_block_rows: int = _MAX_BLOCK_ROWS,
    fused_max_bytes: int = _FUSED_MAX_BYTES,
) -> jax.Array:
    """Numerically-stable softmax over a 1-D array via Pallas TPU kernels."""
    assert x.ndim == 1, "SoftmaxStable operates on a 1-D tensor"
    n = x.shape[0]
    itemsize = jnp.dtype(x.dtype).itemsize

    # ---- choose a lane/sublane-dense (rows, 128) layout ----
    align = _row_align(x.dtype)
    rows = _round_up(pl.cdiv(n, _LANES), align)
    max_block_rows = max(align, _round_up(max_block_rows, align))

    fused = (rows * _LANES * 4 <= fused_max_bytes) and (rows <= max_block_rows)
    if fused:
        block_rows = rows
    else:
        block_rows = min(rows, max_block_rows)
        rows = _round_up(rows, block_rows)
    num_blocks = rows // block_rows
    padded = rows * _LANES

    # ---- pad with -inf only when needed (aligned inputs skip the extra HBM copy) ----
    # -inf never wins the max and contributes exp(-inf)=0 to the sum; by construction
    # every block contains at least one real row.
    if padded != n:
        x_p = jnp.concatenate([x, jnp.full((padded - n,), -jnp.inf, dtype=x.dtype)])
    else:
        x_p = x
    x2d = x_p.reshape(rows, _LANES)

    if fused:
        out2d = pl.pallas_call(
            _fused_softmax_kernel,
            out_shape=jax.ShapeDtypeStruct((rows, _LANES), x.dtype),
            grid=(1,),
            in_specs=[pl.BlockSpec((rows, _LANES), lambda i: (0, 0))],
            out_specs=pl.BlockSpec((rows, _LANES), lambda i: (0, 0)),
            compiler_params=pltpu.CompilerParams(vmem_limit_bytes=_VMEM_LIMIT),
            cost_estimate=pl.CostEstimate(
                flops=5 * padded,
                transcendentals=padded,
                bytes_accessed=2 * padded * itemsize,
            ),
        )(x2d)
    else:
        chunk_spec = pl.BlockSpec((block_rows, _LANES), lambda i: (i, 0))
        c_out_spec = pl.BlockSpec((1, 1), lambda i: (0, 0))  # resident across reduction

        # ---- pass 1: global max & sum-of-exp (sequential reduction axis) ----
        c = pl.pallas_call(
            _reduce_kernel,
            out_shape=jax.ShapeDtypeStruct((1, 1), jnp.float32),
            grid_spec=pltpu.PrefetchScalarGridSpec(
                num_scalar_prefetch=0,
                grid=(num_blocks,),
                in_specs=[chunk_spec],
                out_specs=c_out_spec,
                scratch_shapes=[
                    pltpu.VMEM((1, 1), jnp.float32),  # running max
                    pltpu.VMEM((1, 1), jnp.float32),  # running sum of exp
                ],
            ),
            compiler_params=pltpu.CompilerParams(
                dimension_semantics=("arbitrary",),
                vmem_limit_bytes=_VMEM_LIMIT,
            ),
            cost_estimate=pl.CostEstimate(
                flops=4 * padded,
                transcendentals=padded,
                bytes_accessed=padded * itemsize,
            ),
        )(x2d)

        # ---- pass 2: y = exp(x - c), each chunk independent (parallel axis) ----
        out2d = pl.pallas_call(
            _normalize_kernel,
            out_shape=jax.ShapeDtypeStruct((rows, _LANES), x.dtype),
            grid_spec=pltpu.PrefetchScalarGridSpec(
                num_scalar_prefetch=0,
                grid=(num_blocks,),
                in_specs=[
                    pl.BlockSpec(memory_space=pltpu.MemorySpace.SMEM),  # scalar c
                    chunk_spec,
                ],
                out_specs=chunk_spec,
            ),
            compiler_params=pltpu.CompilerParams(
                dimension_semantics=("parallel",),
                vmem_limit_bytes=_VMEM_LIMIT,
            ),
            cost_estimate=pl.CostEstimate(
                flops=2 * padded,
                transcendentals=padded,
                bytes_accessed=2 * padded * itemsize,
            ),
        )(c, x2d)

    out_flat = out2d.reshape(-1)
    return out_flat if padded == n else out_flat[:n]


if __name__ == "__main__":
    key = jax.random.PRNGKey(0)
    k1, k2, k3 = jax.random.split(key, 3)

    # Case 1: small vector, not a multiple of 128 (exercises -inf padding + fused path).
    n1 = 1000
    x1 = jax.random.normal(k1, (n1,), dtype=jnp.float32) * 5.0
    y1 = jax.block_until_ready(softmax_stable(x1))
    ref1 = jax.nn.softmax(x1)
    assert y1.shape == (n1,)
    assert jnp.allclose(y1, ref1, atol=1e-6, rtol=1e-4), "mismatch vs reference (case 1)"
    assert jnp.allclose(jnp.sum(y1), 1.0, atol=1e-4), "softmax should sum to 1 (case 1)"

    # Case 2: lane-aligned vector, force the multi-block online-reduction two-pass path.
    n2 = 4096
    x2 = jax.random.normal(k2, (n2,), dtype=jnp.float32) * 5.0
    y2 = jax.block_until_ready(softmax_stable(x2, max_block_rows=16))
    ref2 = jax.nn.softmax(x2)
    assert y2.shape == (n2,)
    assert jnp.allclose(y2, ref2, atol=1e-6, rtol=1e-4), "mismatch vs reference (case 2)"
    assert jnp.allclose(jnp.sum(y2), 1.0, atol=1e-4), "softmax should sum to 1 (case 2)"

    # Case 3: large-magnitude values — naive exp would overflow; stable form must not.
    n3 = 2048
    x3 = jax.random.normal(k3, (n3,), dtype=jnp.float32) * 300.0 + 500.0
    y3 = jax.block_until_ready(softmax_stable(x3))
    ref3 = jax.nn.softmax(x3)
    assert jnp.allclose(y3, ref3, atol=1e-6, rtol=1e-4), "mismatch vs reference (case 3)"
    assert bool(jnp.isfinite(y3).all()), "stable softmax must not overflow (case 3)"
    assert jnp.allclose(jnp.sum(y3), 1.0, atol=1e-4), "softmax should sum to 1 (case 3)"

    print("KERNEL_OK")
</pallas_src>

<mosaic_0001>
module attributes {stable_mosaic.version = 11 : i64} {
  func.func @_fused_softmax_kernel(%arg0: i32, %arg1: memref<8x128xf32, #tpu.memory_space<vmem>>, %arg2: memref<8x128xf32, #tpu.memory_space<vmem>>) attributes {dimension_semantics = [#tpu.dimension_semantics<arbitrary>], iteration_bounds = array<i64: 1>, scalar_prefetch = 0 : i64, scratch_operands = 0 : i64, tpu.core_type = #tpu.core_type<tc>, window_params = [{pipeline_mode = #tpu.pipeline_mode<synchronous>, transform_indices = @transform_0, window_bounds = array<i64: 8, 128>}, {pipeline_mode = #tpu.pipeline_mode<synchronous>, transform_indices = @transform_1, window_bounds = array<i64: 8, 128>}]} {
    %c0 = arith.constant 0 : index
    %c0_0 = arith.constant 0 : index
    %0 = vector.load %arg1[%c0, %c0_0] : memref<8x128xf32, #tpu.memory_space<vmem>>, vector<8x128xf32>
    %cst = arith.constant dense<0xFF800000> : vector<128xf32>
    %1 = vector.multi_reduction <maximumf>, %0, %cst [0] : vector<8x128xf32> to vector<128xf32>
    %2 = vector.shape_cast %1 : vector<128xf32> to vector<1x128xf32>
    %cst_1 = arith.constant dense<0xFF800000> : vector<1xf32>
    %3 = vector.multi_reduction <maximumf>, %2, %cst_1 [1] : vector<1x128xf32> to vector<1xf32>
    %4 = vector.shape_cast %3 : vector<1xf32> to vector<1x1xf32>
    %5 = vector.broadcast %4 : vector<1x1xf32> to vector<8x128xf32>
    %6 = arith.subf %0, %5 : vector<8x128xf32>
    %7 = math.exp %6 : vector<8x128xf32>
    %cst_2 = arith.constant dense<0.000000e+00> : vector<128xf32>
    %8 = vector.multi_reduction <add>, %7, %cst_2 [0] : vector<8x128xf32> to vector<128xf32>
    %9 = vector.shape_cast %8 : vector<128xf32> to vector<1x128xf32>
    %cst_3 = arith.constant dense<0.000000e+00> : vector<1xf32>
    %10 = vector.multi_reduction <add>, %9, %cst_3 [1] : vector<1x128xf32> to vector<1xf32>
    %11 = vector.shape_cast %10 : vector<1xf32> to vector<1x1xf32>
    %cst_4 = arith.constant 1.000000e+00 : f32
    %12 = vector.broadcast %cst_4 : f32 to vector<1x1xf32>
    %13 = arith.divf %12, %11 : vector<1x1xf32>
    %14 = vector.broadcast %13 : vector<1x1xf32> to vector<8x128xf32>
    %15 = arith.mulf %7, %14 : vector<8x128xf32>
    %c0_5 = arith.constant 0 : index
    %c0_6 = arith.constant 0 : index
    %16 = vector.load %arg2[%c0_5, %c0_6] : memref<8x128xf32, #tpu.memory_space<vmem>>, vector<8x128xf32>
    tpu.vector_store %arg2[%c0_5, %c0_6], %15 {strides = array<i32>} : memref<8x128xf32, #tpu.memory_space<vmem>>, vector<8x128xf32>,
    return
  }
  func.func @transform_0(%arg0: i32) -> (i32, i32) {
    %c0_i32 = arith.constant 0 : i32
    %c0_i32_0 = arith.constant 0 : i32
    %c0_i32_1 = arith.constant 0 : i32
    return %c0_i32, %c0_i32_0 : i32, i32
  }
  func.func @transform_1(%arg0: i32) -> (i32, i32) {
    %c0_i32 = arith.constant 0 : i32
    %c0_i32_0 = arith.constant 0 : i32
    %c0_i32_1 = arith.constant 0 : i32
    return %c0_i32, %c0_i32_0 : i32, i32
  }
}

</mosaic_0001>

<bundles_post_ra>
// kernel: tpu_custom_call.1
= control target key start
LH: loop header
LB: loop body
LE: loop exit
PB: predicated region body
PF: predicated region fallthrough
CT: control target
= control target key end

     0   :  { %6 = vsyncpa [#allocation3], 0  ;;  %s153_s0 = inlined_call_operand.hbm [shape: f32[8,128], index: 0, kind: input, shape index: {}]   ;;  %s154_s1 = inlined_call_operand.hbm [shape: f32[8,128], index: 1, kind: output, shape index: {}]  }
   0x1   :  { %7 = vsyncpa [#allocation4], 0  ;;  %s13_s8 = sshll.u32 %s153_s0, 4  ;;  %s135_s9 = smov [#allocation2]   ;;  %s14_s8 = int_to_ptr.hbm [resolvable:$true] %s13_s8 }
   0x2   :  { %s15_s10 = sshll.u32 %s135_s9, 4  ;;  %s16_s10 = int_to_ptr.vmem [resolvable:$true] %s15_s10 }
   0x3   :  { %18 = dma.hbm_to_vmem [thread:$0]  %s14_s8, 128, %s16_s10, [#allocation3]  }
   0x4   :  { %131 = dma.done.wait [#allocation3], 128  }
   0x5   :  { %132 = vsyncadd [#allocation3], 4294967168  ;;  %v23_v0 = vld [vmem:[#allocation2] sm:$0xff]  ;;  %s136_s0 = smov [#allocation5]   ;;  %s67_s14 = sshll.u32 %s154_s1, 4  ;;  %s68_s14 = int_to_ptr.hbm [resolvable:$true] %s67_s14 }
   0x6   :  { %v24_v1 = vrot.slane %v23_v0, 4  ;;  %s65_s11 = sshll.u32 %s136_s0, 4  ;;  %s66_s11 = int_to_ptr.vmem [resolvable:$true] %s65_s11 }
   0x8   :  { %v25_v2 = vmax.f32 %v23_v0, %v24_v1 }
   0xa   :  { %v26_v3 = vrot.slane %v25_v2, 2 }
   0xc   :  { %v27_v4 = vmax.f32 %v25_v2, %v26_v3 }
   0xe   :  { %v28_v5 = vrot.slane %v27_v4, 1 }
  0x10   :  { %v29_v6 = vmax.f32 %v27_v4, %v28_v5 }
  0x12   :  { %30 = vmax.xlane.f32.xlu0 %v29_v6 }
  0x85   :  { %v31_v7 = vpop.xlane.xlu0 %30 }
  0x86   :  { %v32_v8 = vsub.f32 %v23_v0, %v31_v7 }
  0x88   :  { %v33_v9 = vmul.f32 1.442695, %v32_v8 }
  0x8a   :  { %79 = vpow2.f32 %v33_v9 }
  0x90   :  { %v80_v10 = vpop.eup %79 }
  0x91   :  { %v35_v11 = vrot.slane %v80_v10, 4 }
  0x93   :  { %v36_v12 = vadd.f32 %v80_v10, %v35_v11 }
  0x95   :  { %v37_v13 = vrot.slane %v36_v12, 2 }
  0x97   :  { %v38_v14 = vadd.f32 %v37_v13, %v36_v12 }
  0x99   :  { %v39_v15 = vrot.slane %v38_v14, 1 }
  0x9b   :  { %v40_v16 = vadd.f32 %v39_v15, %v38_v14 }
  0x9d   :  { %41 = vadd.xlane.f32.xlu0 %v40_v16 }
 0x110   :  { %v42_v17 = vpop.xlane.xlu0 %41 }
 0x111   :  { %81 = vrcp.f32 %v42_v17  ;;  %v54_v21 = vand.u32 2147483648, %v42_v17  ;;  %v52_v23 = vand.u32 2147483647, %v42_v17  ;;  %vm48_vm1 = vweird.f32 %v42_v17 }
 0x113   :  { %v55_v25 = vor.u32 1.1754944e-38, %v54_v21  ;;  %vm53_vm3 = vcmp.eq.f32.partialorder %v52_v23, 8.507059e+37 }
 0x117   :  { %v82_v18 = vpop.eup %81 }
 0x118   :  { %v44_v19 = vmul.f32 %v82_v18, %v42_v17  ;;  %vm49_vm0 = vweird.f32 %v82_v18 }
 0x119   :  { %vm50_vm2 = vmor %vm48_vm1, %vm49_vm0 }
 0x11a   :  { %v45_v20 = vsub.f32 1.0, %v44_v19 }
 0x11c   :  { %v46_v22 = vmul.f32 %v82_v18, %v45_v20 }
 0x11e   :  { %v47_v24 = vadd.f32 %v82_v18, %v46_v22 }
 0x120   :  { %v51_v26 = vsel %vm50_vm2, %v82_v18, %v47_v24 }
 0x121   :  { %v56_v27 = vsel %vm53_vm3, %v55_v25, %v51_v26 }
 0x122   :  { %v58_v28 = vmul.f32 %v80_v10, %v56_v27 }
 0x124   :  { %59 = vst [vmem:[#allocation5] sm:$0xff] %v58_v28 }
 0x125   :  { %70 = dma.vmem_to_hbm [thread:$0]  %s66_s11, 128, %s68_s14, [#allocation4]  }
 0x126   :  { %133 = dma.done.wait [#allocation4], 128  }
 0x127   :  { %134 = vsyncadd [#allocation4], 4294967168 }
 0x128   :  { %75 = vsyncpa [#allocation3], 1 }
 0x129   :  { %76 = vsyncpa [#allocation4], 1 }

</bundles_post_ra>
